<compile_context>
chip_gen: v6e
topology: v6e:2x2x1
jax: 0.10.0
libtpu: 0.0.40
codegen_flags: <defaults>
</compile_context>

<pallas_src>
import functools

import jax
import jax.numpy as jnp
from jax.experimental import pallas as pl
from jax.experimental.pallas import tpu as pltpu


# ---------------------------------------------------------------------------
# Helpers
# ---------------------------------------------------------------------------
def _cdiv(a, b):
    return (a + b - 1) // b


def _round_up(a, m):
    return _cdiv(a, m) * m


def _tpu_tile_defaults():
    """Generation-aware tile / VMEM defaults."""
    kind = ""
    try:
        kind = (jax.devices()[0].device_kind or "").lower()
    except Exception:
        pass
    if "v7" in kind:
        # 64 MiB physical VMEM, 2 TensorCores, ~3.2 TB/s HBM.
        return dict(tm_max=512, tf_max=1024, vmem_limit=48 * 1024 * 1024, two_tc=True)
    if "v6" in kind:
        # 128 MiB VMEM, ~1.4 TB/s HBM -> need big row tiles to reach the MXU roofline.
        return dict(tm_max=1024, tf_max=2048, vmem_limit=96 * 1024 * 1024, two_tc=False)
    if "v5e" in kind or "v5 lite" in kind or "v5lite" in kind:
        # 128 MiB VMEM, ~0.82 TB/s HBM.
        return dict(tm_max=512, tf_max=1024, vmem_limit=64 * 1024 * 1024, two_tc=False)
    # Unknown generation: conservative sizes that fit every chip's VMEM.
    return dict(tm_max=512, tf_max=1024, vmem_limit=32 * 1024 * 1024, two_tc=False)


# ---------------------------------------------------------------------------
# Kernels
# ---------------------------------------------------------------------------
def _ffn_kernel_single(x_ref, w1_ref, b1_ref, w2_ref, b2_ref, o_ref, *, mxu_dtype):
    """d_ff fits a single tile: no accumulator scratch, one fused step per row tile."""
    x = x_ref[...]
    if x.dtype != mxu_dtype:
        x = x.astype(mxu_dtype)                       # in-kernel VPU cast, hidden under MXU
    h = jnp.dot(x, w1_ref[...], preferred_element_type=jnp.float32)
    h = jnp.maximum(h + b1_ref[...], 0.0)             # bias + ReLU in fp32
    # TODO(synk): dropout is identity (eval mode); training-mode dropout not implemented.
    y = jnp.dot(h.astype(mxu_dtype), w2_ref[...], preferred_element_type=jnp.float32)
    o_ref[...] = (y + b2_ref[...]).astype(o_ref.dtype)


def _ffn_kernel_multi(x_ref, w1_ref, b1_ref, w2_ref, b2_ref, o_ref, acc_ref, *,
                      mxu_dtype, n_f_tiles):
    """One (row-tile i, d_ff-tile j) step of  y = relu(x@W1 + b1) @ W2 + b2."""
    j = pl.program_id(1)

    x = x_ref[...]
    if x.dtype != mxu_dtype:
        x = x.astype(mxu_dtype)
    h = jnp.dot(x, w1_ref[...], preferred_element_type=jnp.float32)
    h = jnp.maximum(h + b1_ref[...], 0.0)             # bias + ReLU in fp32
    # TODO(synk): dropout is identity (eval mode); training-mode dropout not implemented.
    partial = jnp.dot(h.astype(mxu_dtype), w2_ref[...],
                      preferred_element_type=jnp.float32)

    @pl.when(j == 0)                                   # first d_ff tile: plain store, no zero-init
    def _():
        acc_ref[...] = partial

    @pl.when(jnp.logical_and(j > 0, j < n_f_tiles - 1))
    def _():
        acc_ref[...] += partial

    @pl.when(j == n_f_tiles - 1)                       # last d_ff tile: fuse bias + writeback
    def _():
        o_ref[...] = (acc_ref[...] + partial + b2_ref[...]).astype(o_ref.dtype)


# ---------------------------------------------------------------------------
# Setup + forward wrapper
# ---------------------------------------------------------------------------
def make_ffn(w1, b1, w2, b2, *, mxu_dtype=jnp.bfloat16, out_dtype=jnp.float32,
             tm_max=None, tf_max=None, vmem_limit=None):
    """Build a PositionWiseFeedForward forward fn.

    Weights are cast to the MXU dtype and padded along d_ff ONCE here, so the
    per-call path does no extra HBM passes over the parameters.
    w1: (d_model, d_ff), w2: (d_ff, d_model)  (i.e. PyTorch weight.T), b1/b2 vectors.
    """
    cfg = _tpu_tile_defaults()
    tm_max = tm_max if tm_max is not None else cfg["tm_max"]
    tf_max = tf_max if tf_max is not None else cfg["tf_max"]
    vmem_limit = vmem_limit if vmem_limit is not None else cfg["vmem_limit"]
    two_tc = cfg["two_tc"]

    d_model, d_ff = w1.shape

    # Balanced d_ff tiling (e.g. d_ff=640 -> tf=384, not 1024-with-60%-padding).
    n_f = max(1, _cdiv(d_ff, tf_max))
    tf = _round_up(_cdiv(d_ff, n_f), 128)
    Fp = _round_up(d_ff, tf)
    n_f = Fp // tf

    # One-time weight cast + d_ff padding.
    # TODO(synk): on v7x, fp8 (e4m3) weights would halve weight HBM traffic if accuracy allows.
    w1c = w1.astype(mxu_dtype)
    w2c = w2.astype(mxu_dtype)
    b1c = b1.reshape(1, d_ff).astype(jnp.float32)
    b2c = b2.reshape(1, d_model).astype(jnp.float32)
    if Fp != d_ff:
        w1c = jnp.pad(w1c, ((0, 0), (0, Fp - d_ff)))
        b1c = jnp.pad(b1c, ((0, 0), (0, Fp - d_ff)))
        w2c = jnp.pad(w2c, ((0, Fp - d_ff), (0, 0)))

    def forward(x):
        B, S, dm = x.shape
        assert dm == d_model
        M = B * S

        # Balanced row tiling; on v7x ensure >=2 row tiles so both TCs get work.
        n_m = max(1, _cdiv(M, tm_max))
        if two_tc and n_m < 2 and M > 8:
            n_m = 2
        tm = _round_up(_cdiv(M, n_m), 8)
        Mp = _round_up(M, tm)
        n_m = Mp // tm

        x2 = x.reshape(M, d_model)          # stays fp32; cast happens inside the kernel
        if Mp != M:
            x2 = jnp.pad(x2, ((0, Mp - M), (0, 0)))

        grid = (n_m, n_f)                   # rows parallel, d_ff reduction axis last
        in_specs = [
            pl.BlockSpec((tm, d_model), lambda i, j: (i, 0)),   # x rows (fp32)
            pl.BlockSpec((d_model, tf), lambda i, j: (0, j)),   # W1 column tile
            pl.BlockSpec((1, tf),       lambda i, j: (0, j)),   # b1 tile
            pl.BlockSpec((tf, d_model), lambda i, j: (j, 0)),   # W2 row tile
            pl.BlockSpec((1, d_model),  lambda i, j: (0, 0)),   # b2
        ]
        out_spec = pl.BlockSpec((tm, d_model), lambda i, j: (i, 0))

        if n_f == 1:
            kernel = functools.partial(_ffn_kernel_single, mxu_dtype=mxu_dtype)
            scratch = []                                   # no accumulator needed
        else:
            kernel = functools.partial(_ffn_kernel_multi, mxu_dtype=mxu_dtype,
                                       n_f_tiles=n_f)
            scratch = [pltpu.VMEM((tm, d_model), jnp.float32)]

        out = pl.pallas_call(
            kernel,
            out_shape=jax.ShapeDtypeStruct((Mp, d_model), out_dtype),
            grid_spec=pltpu.PrefetchScalarGridSpec(
                num_scalar_prefetch=0,
                grid=grid,
                in_specs=in_specs,
                out_specs=out_spec,
                scratch_shapes=scratch,
            ),
            compiler_params=pltpu.CompilerParams(
                dimension_semantics=("parallel", "arbitrary"),
                vmem_limit_bytes=vmem_limit,
            ),
        )(x2, w1c, b1c, w2c, b2c)

        return out[:M].reshape(B, S, d_model)

    return forward


# ---------------------------------------------------------------------------
# Pure-JAX reference
# ---------------------------------------------------------------------------
def ffn_ref(x, w1, b1, w2, b2):
    h = jnp.maximum(jnp.einsum("bsd,df->bsf", x, w1, precision="highest") + b1, 0.0)
    return jnp.einsum("bsf,fd->bsd", h, w2, precision="highest") + b2


# ---------------------------------------------------------------------------
if __name__ == "__main__":
    key = jax.random.PRNGKey(0)
    kx, kw1, kb1, kw2, kb2 = jax.random.split(key, 5)

    # Small shapes consistent with the module: (batch=2, seq=8, d_model=32), d_ff=64.
    B, S, D_MODEL, D_FF = 2, 8, 32, 64
    x = jax.random.normal(kx, (B, S, D_MODEL), jnp.float32)
    # nn.Linear weights stored in (in, out) layout (== PyTorch weight.T), biases as vectors.
    w1 = 0.05 * jax.random.normal(kw1, (D_MODEL, D_FF), jnp.float32)
    b1 = 0.01 * jax.random.normal(kb1, (D_FF,), jnp.float32)
    w2 = 0.05 * jax.random.normal(kw2, (D_FF, D_MODEL), jnp.float32)
    b2 = 0.01 * jax.random.normal(kb2, (D_MODEL,), jnp.float32)

    ref = jax.block_until_ready(ffn_ref(x, w1, b1, w2, b2))

    # 1) fp32 MXU path (tight correctness check; single d_ff tile -> no accumulator).
    ffn_f32 = make_ffn(w1, b1, w2, b2, mxu_dtype=jnp.float32)
    out_f32 = jax.block_until_ready(ffn_f32(x))
    assert out_f32.shape == (B, S, D_MODEL)
    err = float(jnp.max(jnp.abs(out_f32 - ref)))
    assert err < 1e-3, f"fp32 mismatch vs reference: {err}"

    # 2) Production path: bf16 MXU inputs + fp32 accumulation.
    ffn_bf16 = make_ffn(w1, b1, w2, b2, mxu_dtype=jnp.bfloat16)
    out_bf16 = jax.block_until_ready(ffn_bf16(x))
    err = float(jnp.max(jnp.abs(out_bf16 - ref)))
    assert err < 2e-2, f"bf16 mismatch vs reference: {err}"

    # 3) Exercise the multi-d_ff-tile (fp32 accumulator) path with a forced small tf.
    D_FF2 = 256
    kw1b, kw2b = jax.random.split(kw1)
    w1b = 0.05 * jax.random.normal(kw1b, (D_MODEL, D_FF2), jnp.float32)
    b1b = 0.01 * jax.random.normal(kb1, (D_FF2,), jnp.float32)
    w2b = 0.05 * jax.random.normal(kw2b, (D_FF2, D_MODEL), jnp.float32)
    ffn_multi = make_ffn(w1b, b1b, w2b, b2, mxu_dtype=jnp.bfloat16, tf_max=128)
    out_multi = jax.block_until_ready(ffn_multi(x))
    ref_multi = jax.block_until_ready(ffn_ref(x, w1b, b1b, w2b, b2))
    err = float(jnp.max(jnp.abs(out_multi - ref_multi)))
    assert err < 2e-2, f"multi-tile mismatch vs reference: {err}"

    print("KERNEL_OK")
</pallas_src>

<mosaic_0001>
module attributes {stable_mosaic.version = 11 : i64} {
  func.func @_ffn_kernel_single(%arg0: i32, %arg1: i32, %arg2: memref<16x32xf32, #tpu.memory_space<vmem>>, %arg3: memref<32x128xf32, #tpu.memory_space<vmem>>, %arg4: memref<1x128xf32, #tpu.memory_space<vmem>>, %arg5: memref<128x32xf32, #tpu.memory_space<vmem>>, %arg6: memref<1x32xf32, #tpu.memory_space<vmem>>, %arg7: memref<16x32xf32, #tpu.memory_space<vmem>>) attributes {dimension_semantics = [#tpu.dimension_semantics<parallel>, #tpu.dimension_semantics<arbitrary>], iteration_bounds = array<i64: 1, 1>, scalar_prefetch = 0 : i64, scratch_operands = 0 : i64, tpu.core_type = #tpu.core_type<tc>, window_params = [{transform_indices = @transform_0, window_bounds = array<i64: 16, 32>}, {transform_indices = @transform_1, window_bounds = array<i64: 32, 128>}, {transform_indices = @transform_2, window_bounds = array<i64: 1, 128>}, {transform_indices = @transform_3, window_bounds = array<i64: 128, 32>}, {pipeline_mode = #tpu.pipeline_mode<synchronous>, transform_indices = @transform_4, window_bounds = array<i64: 1, 32>}, {transform_indices = @transform_5, window_bounds = array<i64: 16, 32>}]} {
    %c0 = arith.constant 0 : index
    %c0_0 = arith.constant 0 : index
    %0 = vector.load %arg2[%c0, %c0_0] : memref<16x32xf32, #tpu.memory_space<vmem>>, vector<16x32xf32>
    %c0_1 = arith.constant 0 : index
    %c0_2 = arith.constant 0 : index
    %1 = vector.load %arg3[%c0_1, %c0_2] : memref<32x128xf32, #tpu.memory_space<vmem>>, vector<32x128xf32>
    %cst = arith.constant dense<0.000000e+00> : vector<16x128xf32>
    %2 = tpu.matmul %0, %1, %cst {dimension_numbers = #tpu.dot_dimension_numbers<[1], [0], [0], [1], [0, 0, 1, 1], [], []>} : vector<16x32xf32>, vector<32x128xf32>, vector<16x128xf32> -> vector<16x128xf32>
    %c0_3 = arith.constant 0 : index
    %c0_4 = arith.constant 0 : index
    %3 = vector.load %arg4[%c0_3, %c0_4] : memref<1x128xf32, #tpu.memory_space<vmem>>, vector<1x128xf32>
    %4 = vector.broadcast %3 : vector<1x128xf32> to vector<16x128xf32>
    %5 = arith.addf %2, %4 : vector<16x128xf32>
    %cst_5 = arith.constant 0.000000e+00 : f32
    %6 = vector.broadcast %cst_5 : f32 to vector<16x128xf32>
    %7 = arith.maximumf %5, %6 : vector<16x128xf32>
    %c0_6 = arith.constant 0 : index
    %c0_7 = arith.constant 0 : index
    %8 = vector.load %arg5[%c0_6, %c0_7] : memref<128x32xf32, #tpu.memory_space<vmem>>, vector<128x32xf32>
    %cst_8 = arith.constant dense<0.000000e+00> : vector<16x32xf32>
    %9 = tpu.matmul %7, %8, %cst_8 {dimension_numbers = #tpu.dot_dimension_numbers<[1], [0], [0], [1], [0, 0, 1, 1], [], []>} : vector<16x128xf32>, vector<128x32xf32>, vector<16x32xf32> -> vector<16x32xf32>
    %c0_9 = arith.constant 0 : index
    %c0_10 = arith.constant 0 : index
    %10 = vector.load %arg6[%c0_9, %c0_10] : memref<1x32xf32, #tpu.memory_space<vmem>>, vector<1x32xf32>
    %11 = vector.broadcast %10 : vector<1x32xf32> to vector<16x32xf32>
    %12 = arith.addf %9, %11 : vector<16x32xf32>
    %c0_11 = arith.constant 0 : index
    %c0_12 = arith.constant 0 : index
    %13 = vector.load %arg7[%c0_11, %c0_12] : memref<16x32xf32, #tpu.memory_space<vmem>>, vector<16x32xf32>
    tpu.vector_store %arg7[%c0_11, %c0_12], %12 {strides = array<i32>} : memref<16x32xf32, #tpu.memory_space<vmem>>, vector<16x32xf32>,
    return
  }
  func.func @transform_0(%arg0: i32, %arg1: i32) -> (i32, i32) {
    %c0_i32 = arith.constant 0 : i32
    %c0_i32_0 = arith.constant 0 : i32
    return %arg0, %c0_i32 : i32, i32
  }
  func.func @transform_1(%arg0: i32, %arg1: i32) -> (i32, i32) {
    %c0_i32 = arith.constant 0 : i32
    %c0_i32_0 = arith.constant 0 : i32
    return %c0_i32, %arg1 : i32, i32
  }
  func.func @transform_2(%arg0: i32, %arg1: i32) -> (i32, i32) {
    %c0_i32 = arith.constant 0 : i32
    %c0_i32_0 = arith.constant 0 : i32
    return %c0_i32, %arg1 : i32, i32
  }
  func.func @transform_3(%arg0: i32, %arg1: i32) -> (i32, i32) {
    %c0_i32 = arith.constant 0 : i32
    %c0_i32_0 = arith.constant 0 : i32
    return %arg1, %c0_i32 : i32, i32
  }
  func.func @transform_4(%arg0: i32, %arg1: i32) -> (i32, i32) {
    %c0_i32 = arith.constant 0 : i32
    %c0_i32_0 = arith.constant 0 : i32
    %c0_i32_1 = arith.constant 0 : i32
    return %c0_i32, %c0_i32_0 : i32, i32
  }
  func.func @transform_5(%arg0: i32, %arg1: i32) -> (i32, i32) {
    %c0_i32 = arith.constant 0 : i32
    %c0_i32_0 = arith.constant 0 : i32
    return %arg0, %c0_i32 : i32, i32
  }
}

</mosaic_0001>

<bundles_post_ra>
// kernel: tpu_custom_call.1
= control target key start
LH: loop header
LB: loop body
LE: loop exit
PB: predicated region body
PF: predicated region fallthrough
CT: control target
= control target key end

     0   :  { %vm34_vm0 = vcmask 261120   ;;  %s445_s0 = inlined_call_operand.vmem [shape: f32[16,32], index: 0, kind: input, shape index: {}]   ;;  %s446_s1 = inlined_call_operand.vmem [shape: f32[32,128], index: 1, kind: input, shape index: {}]   ;;  %s447_s2 = inlined_call_operand.vmem [shape: f32[1,128], index: 2, kind: input, shape index: {}]   ;;  %s448_s3 = inlined_call_operand.vmem [shape: f32[128,32], index: 3, kind: input, shape index: {}]   ;;  %s449_s4 = inlined_call_operand.vmem [shape: f32[1,32], index: 4, kind: input, shape index: {}]   ;;  %s450_s5 = inlined_call_operand.hbm [shape: f32[16,32], index: 5, kind: output, shape index: {}]  }
   0x1   :  { %v26_v0 = vld [vmem:[%s446_s1 + $0x18] sm:$0xff]  ;;  %v25_v1 = vld [vmem:[%s446_s1 + $0x10] sm:$0xff]  ;;  %v21_v2 = vld [vmem:[%s445_s0] sm:$0xff] }
   0x2   :  { %262 = vmatprep.subr.mxu0 %v26_v0  ;;  %v24_v3 = vld [vmem:[%s446_s1 + $0x8] sm:$0xff]  ;;  %270 = vmatprep.mubr.msk.f32.mxu0 %vm34_vm0, %v21_v2  ;;  %v133_v4 = vld [vmem:[%s448_s3 + $0x78] sm:$0xff]  ;;  %v132_v5 = vld [vmem:[%s448_s3 + $0x70] sm:$0xff] }
   0x3   :  { %263 = vmatpush3.msra.mxu0 %v26_v0  ;;  %273 = vmatprep.subr.mxu1 %v133_v4  ;;  %v23_v6 = vld [vmem:[%s446_s1] sm:$0xff]  ;;  %v131_v7 = vld [vmem:[%s448_s3 + $0x68] sm:$0xff] }
   0x4   :  { %264 = vmatprep.subr.mxu0 %v25_v1  ;;  %274 = vmatpush3.msra.mxu1 %v133_v4  ;;  %v22_v8 = vld [vmem:[%s445_s0 + $0x8] sm:$0xff]  ;;  %v130_v9 = vld [vmem:[%s448_s3 + $0x60] sm:$0xff] }
   0x5   :  { %265 = vmatpush3.msra.mxu0 %v25_v1  ;;  %275 = vmatprep.subr.mxu1 %v132_v5 }
   0x6   :  { %266 = vmatprep.subr.mxu0 %v24_v3  ;;  %276 = vmatpush3.msra.mxu1 %v132_v5 }
   0x7   :  { %267 = vmatpush3.msra.mxu0 %v24_v3 }
   0x8   :  { %10 = vsyncpa [#allocation3], 0  ;;  %268 = vmatprep.subr.mxu0 %v23_v6  ;;  %277 = vmatprep.subr.mxu1 %v131_v7  ;;  %v129_v10 = vld [vmem:[%s448_s3 + $0x58] sm:$0xff]  ;;  %v128_v11 = vld [vmem:[%s448_s3 + $0x50] sm:$0xff] }
   0x9   :  { %269 = vmatpush3.msra.mxu0 %v23_v6  ;;  %278 = vmatpush3.msra.mxu1 %v131_v7  ;;  %v127_v12 = vld [vmem:[%s448_s3 + $0x48] sm:$0xff]  ;;  %v126_v13 = vld [vmem:[%s448_s3 + $0x40] sm:$0xff]  ;;  %v125_v14 = vld [vmem:[%s448_s3 + $0x38] sm:$0xff] }
   0xa   :  { %271 = vmatmul.mubr.msk.f32.vlgmr.msra.gmra.mxu0 %vm34_vm0, %v22_v8  ;;  %279 = vmatprep.subr.mxu1 %v130_v9  ;;  %v124_v15 = vld [vmem:[%s448_s3 + $0x30] sm:$0xff]  ;;  %v123_v16 = vld [vmem:[%s448_s3 + $0x28] sm:$0xff]  ;;  %v122_v17 = vld [vmem:[%s448_s3 + $0x20] sm:$0xff] }
   0xb   :  { %280 = vmatpush3.msra.mxu1 %v130_v9  ;;  %v121_v18 = vld [vmem:[%s448_s3 + $0x18] sm:$0xff]  ;;  %v120_v19 = vld [vmem:[%s448_s3 + $0x10] sm:$0xff]  ;;  %v119_v20 = vld [vmem:[%s448_s3 + $0x8] sm:$0xff] }
   0xc   :  { %281 = vmatprep.subr.mxu1 %v129_v10  ;;  %v118_v21 = vld [vmem:[%s448_s3] sm:$0xff]  ;;  %s333_s3 = smov [#allocation2]  }
   0xd   :  { %282 = vmatpush3.msra.mxu1 %v129_v10  ;;  %v234_v22 = vld [vmem:[%s447_s2] ss:$0 sm:$0xff]  ;;  %s223_s13 = sshll.u32 %s333_s3, 4  ;;  %s224_s13 = int_to_ptr.vmem [resolvable:$true] %s223_s13 }
   0xe   :  { %283 = vmatprep.subr.mxu1 %v128_v11  ;;  %v237_v29 = vld [vmem:[%s449_s4] ss:$0 sm:$0xff]  ;;  %s311_s2 = scalar_lea.vmem %s224_s13, 256  ;;  %p316_p1 = scmp.lt.s32.totalorder %s224_s13, %s224_s13 }
   0xf   :  { %284 = vmatpush3.msra.mxu1 %v128_v11  ;;  %p312_p0 = scmp.ne.s32.totalorder %s224_s13, %s311_s2  ;;  %p317_p2 = scmp.lt.s32.totalorder %s311_s2, %s311_s2 }
  0x10   :  { %285 = vmatprep.subr.mxu1 %v127_v12 }
  0x11   :  { %286 = vmatpush3.msra.mxu1 %v127_v12  ;;  %p318_p3 = por %p317_p2, %p316_p1 }
  0x12   :  { %287 = vmatprep.subr.mxu1 %v126_v13 }
  0x13   :  { %288 = vmatpush3.msra.mxu1 %v126_v13  ;;  %p319_p4 = pnand %p318_p3, %p312_p0 }
  0x14   :  { %289 = vmatprep.subr.mxu1 %v125_v14 }
  0x15   :  { %290 = vmatpush3.msra.mxu1 %v125_v14 }
  0x16   :  { %291 = vmatprep.subr.mxu1 %v124_v15 }
  0x17   :  { %292 = vmatpush3.msra.mxu1 %v124_v15 }
  0x18   :  { %293 = vmatprep.subr.mxu1 %v123_v16 }
  0x19   :  { %294 = vmatpush3.msra.mxu1 %v123_v16 }
  0x1a   :  { %295 = vmatprep.subr.mxu1 %v122_v17 }
  0x1b   :  { %296 = vmatpush3.msra.mxu1 %v122_v17 }
  0x1c   :  { %297 = vmatprep.subr.mxu1 %v121_v18 }
  0x1d   :  { %298 = vmatpush3.msra.mxu1 %v121_v18 }
  0x1e   :  { %299 = vmatprep.subr.mxu1 %v120_v19 }
  0x1f   :  { %300 = vmatpush3.msra.mxu1 %v120_v19 }
  0x20   :  { %301 = vmatprep.subr.mxu1 %v119_v20 }
  0x21   :  { %302 = vmatpush3.msra.mxu1 %v119_v20 }
  0x22   :  { %303 = vmatprep.subr.mxu1 %v118_v21 }
  0x23   :  { %304 = vmatpush3.msra.mxu1 %v118_v21 }
  0xca   :  { %v272_v23 = vpop.f32.mrf.mxu0 }
  0xcb   :  { %v113_v24 = vadd.f32 %v272_v23, %v234_v22 }
  0xcc   :  { %v107_v25 = vpop.f32.mrf.mxu0 }
  0xcd   :  { %v108_v26 = vadd.f32 %v234_v22, %v107_v25  ;;  %v117_v28 = vmax.f32 %v113_v24, 0.0 }
  0xcf   :  { %v116_v27 = vmax.f32 %v108_v26, 0.0 }
  0xd1   :  { %305 = vmatprep.mubr.f32.mxu1 %v116_v27 }
  0xd2   :  { %306 = vmatmul.mubr.f32.vlgmr.msra.gmra.mxu1 %v117_v28 }
 0x192   :  { %v307_v30 = vpop.f32.mrf.mxu1 }
 0x193   :  { %v213_v31 = vadd.f32 %v307_v30, %v237_v29 }
 0x194   :  { %v207_v32 = vpop.f32.mrf.mxu1 }
 0x195   :  { %217 = vst.msk [vmem:[#allocation2 + $0x8] sm:$0xff] %vm34_vm0, %v213_v31  ;;  %v208_v33 = vadd.f32 %v237_v29, %v207_v32 }
 0x197   :  { %216 = vst.msk [vmem:[#allocation2] sm:$0xff] %vm34_vm0, %v208_v33 }
 0x198   :  { %322 = shalt.err (!%p319_p4)
}
 0x199   :  { %s334_s14 = smov 128   ;;  %s335_s4 = smov 8  }
 0x19a   :  { %229 = dma.vmem_to_hbm [thread:$0]  %s224_s13, 256, %s450_s5, [#allocation3], %s334_s14, %s334_s14, %s335_s4  }
 0x19b   :  { %331 = dma.done.wait [#allocation3], 256  }
 0x19c   :  { %332 = vsyncadd [#allocation3], 4294967040 }
 0x19d   :  { %233 = vsyncpa [#allocation3], 1 }

</bundles_post_ra>
